<compile_context>
chip_gen: v6e
topology: v6e:2x2x1
jax: 0.10.0
libtpu: 0.0.40
codegen_flags: <defaults>
</compile_context>

<pallas_src>
import jax
import jax.numpy as jnp
from jax.experimental import pallas as pl
from jax.experimental.pallas import tpu as pltpu

C_IN, C_IN_PAD, C_H1, C_H2, C_OUT = 9, 16, 64, 128, 256


# ---------------------------------------------------------------------------
# Pallas kernel: 3-layer pointwise MLP in channels-first layout.
#   H1 = relu(W1 @ X + b1)   (64,  TP)
#   H2 = relu(W2 @ H1 + b2)  (128, TP)
#   O  =      W3 @ H2 + b3   (256, TP)
# ---------------------------------------------------------------------------
def _pointwise_mlp_kernel(x_ref, w1_ref, b1_ref, w2_ref, b2_ref,
                          w3_ref, b3_ref, o_ref):
    x = x_ref[...]                                                # (16, TP) bf16
    h = jnp.dot(w1_ref[...], x,
                preferred_element_type=jnp.float32) + b1_ref[...]
    h = jnp.maximum(h, 0.0).astype(jnp.bfloat16)                  # (64, TP)
    h = jnp.dot(w2_ref[...], h,
                preferred_element_type=jnp.float32) + b2_ref[...]
    h = jnp.maximum(h, 0.0).astype(jnp.bfloat16)                  # (128, TP)
    o = jnp.dot(w3_ref[...], h,
                preferred_element_type=jnp.float32) + b3_ref[...]
    o_ref[...] = o.astype(o_ref.dtype)                            # (256, TP)


def _pick_point_tile(M, tile_p):
    """Largest multiple-of-128 tile <= tile_p that divides the 128-rounded M,
    so m_pad == m128 and the output slice is a no-op when M % 128 == 0."""
    m128 = ((M + 127) // 128) * 128
    if m128 <= tile_p:
        return m128, m128
    tp = 128
    for cand in range(tile_p - (tile_p % 128), 127, -128):
        if m128 % cand == 0:
            tp = cand
            break
    return tp, m128


def pointwise_mlp_ncw(x_cf, w1t, b1, w2t, b2, w3t, b3,
                      tile_p=1024, out_dtype=jnp.bfloat16):
    """x_cf: (B, 9, M) -> (B, 256, m_pad) in NCW layout (m_pad == 128-rounded M)."""
    assert tile_p % 128 == 0, "tile_p must be a multiple of 128 (lane width)"
    B, cin, M = x_cf.shape
    assert cin in (C_IN, C_IN_PAD)

    tp, m_pad = _pick_point_tile(M, tile_p)

    x = x_cf.astype(jnp.bfloat16)
    if cin != C_IN_PAD or m_pad != M:
        # cheap: <=16 channels; pads K to 16 (clean bf16 sublane packing) and
        # only the tail point tile.
        x = jnp.pad(x, ((0, 0), (0, C_IN_PAD - cin), (0, m_pad - M)))

    out_bytes = jnp.dtype(out_dtype).itemsize
    # VMEM: resident weights/biases + double-buffered X/out tiles + the fp32
    # layer intermediates and their bf16 recasts (these spill to VMEM: the
    # 256 x tp fp32 result alone exceeds the 64-vreg file).
    vmem_est = (
        (C_H1 * C_IN_PAD + C_H2 * C_H1 + C_OUT * C_H2) * 2        # bf16 weights
        + (C_H1 + C_H2 + C_OUT) * 4                               # fp32 biases
        + 2 * C_IN_PAD * tp * 2                                   # X tile (x2 buf)
        + 2 * C_OUT * tp * out_bytes                              # out tile (x2 buf)
        + (C_H1 + C_H2 + C_OUT) * tp * 4                          # fp32 intermediates
        + (C_H1 + C_H2) * tp * 2                                  # bf16 H1/H2 copies
    )
    try:
        vmem_cap = int(pltpu.get_tpu_info().vmem_capacity_bytes)
    except Exception:
        vmem_cap = 64 << 20                                       # v7x-safe fallback
    vmem_limit = int(max(min(2 * vmem_est + (4 << 20), (vmem_cap * 3) // 4),
                         16 << 20))

    out = pl.pallas_call(
        _pointwise_mlp_kernel,
        out_shape=jax.ShapeDtypeStruct((B, C_OUT, m_pad), out_dtype),
        grid_spec=pltpu.PrefetchScalarGridSpec(
            num_scalar_prefetch=0,
            # point-tile axis first: it carries the v7x megacore split when B
            # is 1-2; both axes are independent ("parallel").
            grid=(m_pad // tp, B),
            in_specs=[
                pl.BlockSpec((pl.Squeezed(), C_IN_PAD, tp),
                             lambda i, b: (b, 0, i)),              # X tile (16, tp)
                pl.BlockSpec((C_H1, C_IN_PAD), lambda i, b: (0, 0)),  # W1 (64,16)
                pl.BlockSpec((C_H1, 1),        lambda i, b: (0, 0)),  # b1
                pl.BlockSpec((C_H2, C_H1),     lambda i, b: (0, 0)),  # W2 (128,64)
                pl.BlockSpec((C_H2, 1),        lambda i, b: (0, 0)),  # b2
                pl.BlockSpec((C_OUT, C_H2),    lambda i, b: (0, 0)),  # W3 (256,128)
                pl.BlockSpec((C_OUT, 1),       lambda i, b: (0, 0)),  # b3
            ],
            out_specs=pl.BlockSpec((pl.Squeezed(), C_OUT, tp),
                                   lambda i, b: (b, 0, i)),
        ),
        compiler_params=pltpu.CompilerParams(
            dimension_semantics=("parallel", "parallel"),
            vmem_limit_bytes=vmem_limit),
    )(x, w1t, b1, w2t, b2, w3t, b3)
    return out


# ---------------------------------------------------------------------------
# Plain-JAX glue: geometric feature construction (the reference helpers are
# undefined stubs; standard PCA-neighborhood definitions are used).
# ---------------------------------------------------------------------------
def find_knn(points, k):
    """points: (B, M, 3) -> knn indices (B, M, k) (self included).
    Uses the ||a||^2 + ||b||^2 - 2 a.b^T formulation (runs on the MXU)."""
    sq = jnp.sum(points * points, axis=-1)                        # (B, M)
    d2 = (sq[:, :, None] + sq[:, None, :]
          - 2.0 * jnp.einsum('bmd,bnd->bmn', points, points))
    _, idx = jax.lax.top_k(-d2, k)
    return idx


def _gather_neighbors(points, knn_idx):
    return jax.vmap(lambda p, i: p[i])(points, knn_idx)           # (B, M, k, 3)


def _symeig3x3_smallest(cov, eps=1e-12):
    """Closed-form smallest eigenpair of batched symmetric 3x3 matrices.
    Returns (evec_min (...,3), eval_min (...,), trace (...,))."""
    a00 = cov[..., 0, 0]; a11 = cov[..., 1, 1]; a22 = cov[..., 2, 2]
    a01 = cov[..., 0, 1]; a02 = cov[..., 0, 2]; a12 = cov[..., 1, 2]
    tr = a00 + a11 + a22
    q = tr / 3.0
    p1 = a01 * a01 + a02 * a02 + a12 * a12
    p2 = (a00 - q) ** 2 + (a11 - q) ** 2 + (a22 - q) ** 2 + 2.0 * p1
    p = jnp.sqrt(jnp.maximum(p2, 0.0) / 6.0)
    p_safe = jnp.maximum(p, eps)
    b00 = (a00 - q) / p_safe; b11 = (a11 - q) / p_safe; b22 = (a22 - q) / p_safe
    b01 = a01 / p_safe; b02 = a02 / p_safe; b12 = a12 / p_safe
    detb = (b00 * (b11 * b22 - b12 * b12)
            - b01 * (b01 * b22 - b12 * b02)
            + b02 * (b01 * b12 - b11 * b02))
    r = jnp.clip(detb / 2.0, -1.0, 1.0)
    phi = jnp.arccos(r) / 3.0
    eig_min = q + 2.0 * p * jnp.cos(phi + 2.0 * jnp.pi / 3.0)
    eig_min = jnp.where(p2 <= eps, q, eig_min)                    # isotropic case

    # Eigenvector of eig_min: best cross product of rows of (A - lambda I).
    lam = eig_min
    r0 = jnp.stack([a00 - lam, a01, a02], axis=-1)
    r1 = jnp.stack([a01, a11 - lam, a12], axis=-1)
    r2 = jnp.stack([a02, a12, a22 - lam], axis=-1)
    c01 = jnp.cross(r0, r1); c02 = jnp.cross(r0, r2); c12 = jnp.cross(r1, r2)
    n01 = jnp.sum(c01 * c01, -1, keepdims=True)
    n02 = jnp.sum(c02 * c02, -1, keepdims=True)
    n12 = jnp.sum(c12 * c12, -1, keepdims=True)
    best = jnp.where((n01 >= n02) & (n01 >= n12), c01,
                     jnp.where(n02 >= n12, c02, c12))
    bestn = jnp.sum(best * best, -1, keepdims=True)
    fallback = jnp.broadcast_to(jnp.array([0.0, 0.0, 1.0], best.dtype), best.shape)
    # TODO(synk): normals are sign-ambiguous (unoriented); orient toward a
    # viewpoint if the downstream consumer needs consistent orientation.
    normal = jnp.where(bestn > eps,
                       best / jnp.sqrt(jnp.maximum(bestn, eps)), fallback)
    return normal, eig_min, tr


def estimate_normals_and_curvature(points, knn_idx):
    nbrs = _gather_neighbors(points, knn_idx)                     # (B, M, k, 3)
    centered = nbrs - nbrs.mean(axis=2, keepdims=True)
    cov = jnp.einsum('bmki,bmkj->bmij', centered, centered) / knn_idx.shape[-1]
    normals, eig_min, tr = _symeig3x3_smallest(cov)
    curvature = eig_min / (tr + 1e-8)                             # (B, M)
    return normals, curvature[..., None]                          # (B,M,3),(B,M,1)


def compute_local_features(points, knn_idx):
    nbrs = _gather_neighbors(points, knn_idx)                     # (B, M, k, 3)
    d = jnp.linalg.norm(nbrs - points[:, :, None, :], axis=-1)    # (B, M, k)
    return jnp.stack([d.mean(axis=-1), d.max(axis=-1)], axis=-1)  # (B, M, 2)


# ---------------------------------------------------------------------------
# GeometricModule
# ---------------------------------------------------------------------------
class GeometricModule:
    def __init__(self, k_neighbors=20, key=jax.random.PRNGKey(42),
                 tile_p=1024, out_dtype=jnp.bfloat16):
        self.k = k_neighbors
        self.tile_p = tile_p
        self.out_dtype = out_dtype                                # fp32 available
        ks = jax.random.split(key, 6)

        def init_linear(kw, kb, cin, cout, cin_pad=None):
            # PyTorch Conv1d(k=1) init: U(-1/sqrt(cin), 1/sqrt(cin))
            bound = 1.0 / (cin ** 0.5)
            w = jax.random.uniform(kw, (cout, cin), jnp.float32, -bound, bound)
            if cin_pad is not None and cin_pad > cin:
                w = jnp.pad(w, ((0, 0), (0, cin_pad - cin)))      # zero-pad K
            b = jax.random.uniform(kb, (cout, 1), jnp.float32, -bound, bound)
            return w.astype(jnp.bfloat16), b                      # bf16 weights

        self.w1t, self.b1 = init_linear(ks[0], ks[1], C_IN, C_H1, cin_pad=C_IN_PAD)
        self.w2t, self.b2 = init_linear(ks[2], ks[3], C_H1, C_H2)
        self.w3t, self.b3 = init_linear(ks[4], ks[5], C_H2, C_OUT)

    def __call__(self, point_cloud, vis_mask, m_visible=None):
        """
        point_cloud: (B, N, 3) float32
        vis_mask:    (B, N) bool, same number of True entries per batch row
        m_visible:   optional static int (required when called under jax.jit)
        returns:     (B, 256, M_visible) in self.out_dtype (NCW, like Conv1d)
        """
        B, N, _ = point_cloud.shape
        if m_visible is None:
            # TODO(synk): host sync; pass m_visible explicitly when jitting.
            m_visible = int(jnp.sum(vis_mask)) // B
        M = m_visible

        # gather visible points (stable order, equivalent to boolean indexing)
        order = jnp.argsort(jnp.where(vis_mask, 0, 1), axis=1, stable=True)
        idx = order[:, :M]                                        # (B, M)
        visible = jnp.take_along_axis(point_cloud, idx[..., None], axis=1)

        knn_idx = find_knn(visible, k=self.k)
        normals, curvature = estimate_normals_and_curvature(visible, knn_idx)
        local_features = compute_local_features(visible, knn_idx)

        # NOTE: coordinates feed a bf16 path; center/normalize them upstream if
        # exact fp32 Conv1d parity matters for large-magnitude coordinates.
        combined = jnp.concatenate(
            [visible, normals, curvature, local_features], axis=-1)  # (B, M, 9)

        # cheap channels-first transpose of the 9-wide input; the 256-wide
        # output comes straight out of the kernel in NCW layout.
        x_cf = combined.transpose(0, 2, 1)                        # (B, 9, M)
        out = pointwise_mlp_ncw(x_cf, self.w1t, self.b1, self.w2t, self.b2,
                                self.w3t, self.b3, tile_p=self.tile_p,
                                out_dtype=self.out_dtype)
        if out.shape[-1] != M:
            out = out[:, :, :M]      # no-op (skipped) when M % 128 == 0
        return out


# ---------------------------------------------------------------------------
if __name__ == "__main__":
    B, N, M_VIS, K = 2, 16, 8, 4

    key = jax.random.PRNGKey(0)
    k_pc, k_mask = jax.random.split(key)
    point_cloud = jax.random.normal(k_pc, (B, N, 3), jnp.float32)

    # deterministic visibility mask with exactly M_VIS visible points per batch
    scores = jax.random.uniform(k_mask, (B, N))
    _, sel = jax.lax.top_k(scores, M_VIS)
    vis_mask = jnp.zeros((B, N), bool).at[jnp.arange(B)[:, None], sel].set(True)

    module = GeometricModule(k_neighbors=K)
    geom_features = module(point_cloud, vis_mask, m_visible=M_VIS)
    geom_features = jax.block_until_ready(geom_features)

    assert geom_features.shape == (B, C_OUT, M_VIS), geom_features.shape
    assert geom_features.dtype == jnp.bfloat16, geom_features.dtype
    assert bool(jnp.all(jnp.isfinite(geom_features.astype(jnp.float32))))
    print("KERNEL_OK")
</pallas_src>

<mosaic_0001>
module attributes {stable_mosaic.version = 11 : i64} {
  func.func @_pointwise_mlp_kernel(%arg0: i32, %arg1: i32, %arg2: memref<1x16x128xbf16, #tpu.memory_space<vmem>>, %arg3: memref<64x16xbf16, #tpu.memory_space<vmem>>, %arg4: memref<64x1xf32, #tpu.memory_space<vmem>>, %arg5: memref<128x64xbf16, #tpu.memory_space<vmem>>, %arg6: memref<128x1xf32, #tpu.memory_space<vmem>>, %arg7: memref<256x128xbf16, #tpu.memory_space<vmem>>, %arg8: memref<256x1xf32, #tpu.memory_space<vmem>>, %arg9: memref<1x256x128xbf16, #tpu.memory_space<vmem>>) attributes {dimension_semantics = [#tpu.dimension_semantics<parallel>, #tpu.dimension_semantics<parallel>], iteration_bounds = array<i64: 1, 2>, scalar_prefetch = 0 : i64, scratch_operands = 0 : i64, tpu.core_type = #tpu.core_type<tc>, window_params = [{transform_indices = @transform_0, window_bounds = array<i64: 1, 16, 128>}, {pipeline_mode = #tpu.pipeline_mode<synchronous>, transform_indices = @transform_1, window_bounds = array<i64: 64, 16>}, {pipeline_mode = #tpu.pipeline_mode<synchronous>, transform_indices = @transform_2, window_bounds = array<i64: 64, 1>}, {pipeline_mode = #tpu.pipeline_mode<synchronous>, transform_indices = @transform_3, window_bounds = array<i64: 128, 64>}, {pipeline_mode = #tpu.pipeline_mode<synchronous>, transform_indices = @transform_4, window_bounds = array<i64: 128, 1>}, {pipeline_mode = #tpu.pipeline_mode<synchronous>, transform_indices = @transform_5, window_bounds = array<i64: 256, 128>}, {pipeline_mode = #tpu.pipeline_mode<synchronous>, transform_indices = @transform_6, window_bounds = array<i64: 256, 1>}, {transform_indices = @transform_7, window_bounds = array<i64: 1, 256, 128>}]} {
    %c0 = arith.constant 0 : index
    %c0_0 = arith.constant 0 : index
    %c0_1 = arith.constant 0 : index
    %0 = vector.load %arg2[%c0, %c0_0, %c0_1] : memref<1x16x128xbf16, #tpu.memory_space<vmem>>, vector<1x16x128xbf16>
    %1 = vector.shape_cast %0 : vector<1x16x128xbf16> to vector<16x128xbf16>
    %c0_2 = arith.constant 0 : index
    %c0_3 = arith.constant 0 : index
    %2 = vector.load %arg3[%c0_2, %c0_3] : memref<64x16xbf16, #tpu.memory_space<vmem>>, vector<64x16xbf16>
    %cst = arith.constant dense<0.000000e+00> : vector<64x128xf32>
    %3 = tpu.matmul %2, %1, %cst {dimension_numbers = #tpu.dot_dimension_numbers<[1], [0], [0], [1], [0, 0, 1, 1], [], []>} : vector<64x16xbf16>, vector<16x128xbf16>, vector<64x128xf32> -> vector<64x128xf32>
    %c0_4 = arith.constant 0 : index
    %c0_5 = arith.constant 0 : index
    %4 = vector.load %arg4[%c0_4, %c0_5] : memref<64x1xf32, #tpu.memory_space<vmem>>, vector<64x1xf32>
    %5 = vector.broadcast %4 : vector<64x1xf32> to vector<64x128xf32>
    %6 = arith.addf %3, %5 : vector<64x128xf32>
    %cst_6 = arith.constant 0.000000e+00 : f32
    %7 = vector.broadcast %cst_6 : f32 to vector<64x128xf32>
    %8 = arith.maximumf %6, %7 : vector<64x128xf32>
    %9 = arith.truncf %8 : vector<64x128xf32> to vector<64x128xbf16>
    %c0_7 = arith.constant 0 : index
    %c0_8 = arith.constant 0 : index
    %10 = vector.load %arg5[%c0_7, %c0_8] : memref<128x64xbf16, #tpu.memory_space<vmem>>, vector<128x64xbf16>
    %cst_9 = arith.constant dense<0.000000e+00> : vector<128x128xf32>
    %11 = tpu.matmul %10, %9, %cst_9 {dimension_numbers = #tpu.dot_dimension_numbers<[1], [0], [0], [1], [0, 0, 1, 1], [], []>} : vector<128x64xbf16>, vector<64x128xbf16>, vector<128x128xf32> -> vector<128x128xf32>
    %c0_10 = arith.constant 0 : index
    %c0_11 = arith.constant 0 : index
    %12 = vector.load %arg6[%c0_10, %c0_11] : memref<128x1xf32, #tpu.memory_space<vmem>>, vector<128x1xf32>
    %13 = vector.broadcast %12 : vector<128x1xf32> to vector<128x128xf32>
    %14 = arith.addf %11, %13 : vector<128x128xf32>
    %cst_12 = arith.constant 0.000000e+00 : f32
    %15 = vector.broadcast %cst_12 : f32 to vector<128x128xf32>
    %16 = arith.maximumf %14, %15 : vector<128x128xf32>
    %17 = arith.truncf %16 : vector<128x128xf32> to vector<128x128xbf16>
    %c0_13 = arith.constant 0 : index
    %c0_14 = arith.constant 0 : index
    %18 = vector.load %arg7[%c0_13, %c0_14] : memref<256x128xbf16, #tpu.memory_space<vmem>>, vector<256x128xbf16>
    %cst_15 = arith.constant dense<0.000000e+00> : vector<256x128xf32>
    %19 = tpu.matmul %18, %17, %cst_15 {dimension_numbers = #tpu.dot_dimension_numbers<[1], [0], [0], [1], [0, 0, 1, 1], [], []>} : vector<256x128xbf16>, vector<128x128xbf16>, vector<256x128xf32> -> vector<256x128xf32>
    %c0_16 = arith.constant 0 : index
    %c0_17 = arith.constant 0 : index
    %20 = vector.load %arg8[%c0_16, %c0_17] : memref<256x1xf32, #tpu.memory_space<vmem>>, vector<256x1xf32>
    %21 = vector.broadcast %20 : vector<256x1xf32> to vector<256x128xf32>
    %22 = arith.addf %19, %21 : vector<256x128xf32>
    %23 = arith.truncf %22 : vector<256x128xf32> to vector<256x128xbf16>
    %c0_18 = arith.constant 0 : index
    %c0_19 = arith.constant 0 : index
    %c0_20 = arith.constant 0 : index
    %24 = vector.load %arg9[%c0_18, %c0_19, %c0_20] : memref<1x256x128xbf16, #tpu.memory_space<vmem>>, vector<1x256x128xbf16>
    %25 = vector.shape_cast %24 : vector<1x256x128xbf16> to vector<256x128xbf16>
    %26 = vector.shape_cast %23 : vector<256x128xbf16> to vector<1x256x128xbf16>
    tpu.vector_store %arg9[%c0_18, %c0_19, %c0_20], %26 {strides = array<i32>} : memref<1x256x128xbf16, #tpu.memory_space<vmem>>, vector<1x256x128xbf16>,
    return
  }
  func.func @transform_0(%arg0: i32, %arg1: i32) -> (i32, i32, i32) {
    %c0_i32 = arith.constant 0 : i32
    %c0_i32_0 = arith.constant 0 : i32
    return %arg1, %c0_i32, %arg0 : i32, i32, i32
  }
  func.func @transform_1(%arg0: i32, %arg1: i32) -> (i32, i32) {
    %c0_i32 = arith.constant 0 : i32
    %c0_i32_0 = arith.constant 0 : i32
    %c0_i32_1 = arith.constant 0 : i32
    return %c0_i32, %c0_i32_0 : i32, i32
  }
  func.func @transform_2(%arg0: i32, %arg1: i32) -> (i32, i32) {
    %c0_i32 = arith.constant 0 : i32
    %c0_i32_0 = arith.constant 0 : i32
    %c0_i32_1 = arith.constant 0 : i32
    return %c0_i32, %c0_i32_0 : i32, i32
  }
  func.func @transform_3(%arg0: i32, %arg1: i32) -> (i32, i32) {
    %c0_i32 = arith.constant 0 : i32
    %c0_i32_0 = arith.constant 0 : i32
    %c0_i32_1 = arith.constant 0 : i32
    return %c0_i32, %c0_i32_0 : i32, i32
  }
  func.func @transform_4(%arg0: i32, %arg1: i32) -> (i32, i32) {
    %c0_i32 = arith.constant 0 : i32
    %c0_i32_0 = arith.constant 0 : i32
    %c0_i32_1 = arith.constant 0 : i32
    return %c0_i32, %c0_i32_0 : i32, i32
  }
  func.func @transform_5(%arg0: i32, %arg1: i32) -> (i32, i32) {
    %c0_i32 = arith.constant 0 : i32
    %c0_i32_0 = arith.constant 0 : i32
    %c0_i32_1 = arith.constant 0 : i32
    return %c0_i32, %c0_i32_0 : i32, i32
  }
  func.func @transform_6(%arg0: i32, %arg1: i32) -> (i32, i32) {
    %c0_i32 = arith.constant 0 : i32
    %c0_i32_0 = arith.constant 0 : i32
    %c0_i32_1 = arith.constant 0 : i32
    return %c0_i32, %c0_i32_0 : i32, i32
  }
  func.func @transform_7(%arg0: i32, %arg1: i32) -> (i32, i32, i32) {
    %c0_i32 = arith.constant 0 : i32
    %c0_i32_0 = arith.constant 0 : i32
    return %arg1, %c0_i32, %arg0 : i32, i32, i32
  }
}

</mosaic_0001>

<bundles_post_ra>
// kernel: tpu_custom_call.1
= control target key start
LH: loop header
LB: loop body
LE: loop exit
PB: predicated region body
PF: predicated region fallthrough
CT: control target
= control target key end

     0   :  { %12 = vsyncpa [#allocation3], 0  ;;  %s2526_s0 = inlined_call_operand.vmem [shape: bf16[2,16,128], index: 0, kind: input, shape index: {}]   ;;  %s2527_s1 = inlined_call_operand.vmem [shape: bf16[64,16], index: 1, kind: input, shape index: {}]   ;;  %s2528_s2 = inlined_call_operand.vmem [shape: f32[64,1], index: 2, kind: input, shape index: {}]   ;;  %s2529_s3 = inlined_call_operand.vmem [shape: bf16[128,64], index: 3, kind: input, shape index: {}]   ;;  %s2530_s4 = inlined_call_operand.vmem [shape: f32[128,1], index: 4, kind: input, shape index: {}]   ;;  %s2531_s5 = inlined_call_operand.vmem [shape: bf16[256,128], index: 5, kind: input, shape index: {}]   ;;  %s2532_s6 = inlined_call_operand.vmem [shape: f32[256,1], index: 6, kind: input, shape index: {}]   ;;  %s2533_s7 = inlined_call_operand.hbm [shape: bf16[2,256,128], index: 7, kind: output, shape index: {}]  }
   0x1   :  { %14 = vsyncpa [#allocation3 + $0x1], 0  ;;  %s2074_s24 = smov 0   ;;  %s2076_s25 = smov 0  }
   0x2   :  { %s2078_s26 = smov 0   ;;  %s2080_s27 = smov 0  }
   0x3   :  { %s2082_s28 = smov 0   ;;  %s2084_s29 = smov 0  }
   0x4 LB: > { %s1509_s30 = sadd.s32 4294967295, %s2028_s29   ;;  %s1510_s8 = sadd.s32 4294967294, %s2028_s29   ;;  %s2028_s29 = sphi %s2084_s29, %s20_s29   ;;  %s2024_s28 = sphi %s2082_s28, %s2540_s28   ;;  %s2020_s27 = sphi %s2080_s27, %s2539_s27   ;;  %s2016_s26 = sphi %s2078_s26, %s2538_s26   ;;  %s2012_s25 = sphi %s2076_s25, %s2537_s25   ;;  %s2008_s24 = sphi %s2074_s24, %s2536_s24  }
   0x5   : > { %s29_s9 = sadd.s32 1, %s2024_s28  ;;  %s195_s10 = sadd.s32 1, %s2016_s26 }
   0x6   : > { %p30_p0 = scmp.ge.s32.totalorder %s29_s9, 2  ;;  %p205_p1 = scmp.ne.s32.totalorder %s2016_s26, %s2012_s25 }
   0x7   : > { %p206_p2 = scmp.eq.s32.totalorder %s1509_s30, 1  ;;  %p211_p3 = scmp.ne.s32.totalorder %s2012_s25, %s2008_s24 }
   0x8   : > { %s2542_s9 = smov (%p30_p0, %s29_s9), 0  ;;  %p212_p5 = scmp.eq.s32.totalorder %s1510_s8, 1 }
   0x9   : > { %p2114_p4 = por %p206_p2, %p205_p1  ;;  %s190_s12 = ssub.s32 %s2024_s28, %s2542_s9 }
   0xa   : > { %p1513_p6 = scmp.ge.s32.totalorder %s2028_s29, 1  ;;  %p193_p7 = scmp.eq.s32.totalorder %s190_s12, 0 }
   0xb   : > { %p2121_p8 = por %p212_p5, %p211_p3  ;;  %p259_p9 = scmp.lt.s32.totalorder %s2028_s29, 3 }
   0xc   : > { %s2127_s14 = scalar_select %p193_p7, %s2016_s26, %s195_s10  }
   0xd   : > { %p260_p10 = pnand %p1513_p6, %p259_p9 }
   0xe   : > { %p294_p11 = scmp.lt.s32.totalorder (!%p260_p10), %s2020_s27, 1  ;;  %s291_s19 = sand.u32 (!%p260_p10), 1, %s2012_s25  }
   0xf   : > { %263 = sbr.rel (%p260_p10) target bundleno = 766 (0x2fe), region = 48  ;;  %s1514_s20 = sshll.u32 (!%p260_p10), %s291_s19, 7 }
  0x10   : > { %s2439_s22 = scalar_lea.vmem (!%p260_p10), [#allocation2], %s1514_s20  ;;  %s2031_s15 = smov (!%p260_p10), [#allocation2]  }
  0x11   : > { %s1431_s23 = sshll.u32 (!%p260_p10), %s2439_s22, 4  ;;  %s2475_s23 = int_to_ptr.vmem [resolvable:$true] %s1431_s23 }
  0x12   : > { %s1952_s12 = scalar_lea.vmem (!%p260_p10), %s2475_s23, 2048 }
  0x13   : > { %p1953_p12 = scmp.ne.s32.totalorder (!%p260_p10), %s2475_s23, %s1952_s12 }
  0x14   : > { %v319_v0 = vld [vmem:[%s2528_s2 + $0x30] sm:$0xff]  ;;  %v317_v1 = vld [vmem:[%s2528_s2 + $0x20] sm:$0xff]  ;;  %v2030_v2 = vmov 0   ;;  %v320_v3 = vld [vmem:[%s2528_s2 + $0x38] sm:$0xff]  ;;  %vm387_vm0 = vcmask 130048   ;;  %s295_s21 = scalar_select %p294_p11, %s2020_s27, 1 }
  0x15   : > { %1922 = vset.pattern.permute.xlu1 %v2030_v2  ;;  %1921 = vset.pattern.permute.xlu0 %v2030_v2  ;;  %v1924_v4 = vld [vmem:[%s2527_s1] sm:$0xff]   ;;  %v318_v5 = vld [vmem:[%s2528_s2 + $0x28] sm:$0xff]  ;;  %v316_v6 = vld [vmem:[%s2528_s2 + $0x18] sm:$0xff]  ;;  %vm629_vm1 = vcmask 523264   ;;  %p1954_p13 = pnand %p1953_p12, %p2114_p4 }
  0x16   : > { %353 = vperm.xlu0 %1921, %v319_v0   ;;  %343 = vperm.xlu1 %1922, %v317_v1   ;;  %s1595_s10 = sshll.u32 %s295_s21, 3  ;;  %v315_v8 = vld [vmem:[%s2528_s2 + $0x10] sm:$0xff]  ;;  %v1925_v9 = vld [vmem:[%s2527_s1 + $0x8] sm:$0xff]   ;;  %v313_v12 = vld [vmem:[%s2528_s2] sm:$0xff]  ;;  %s1628_s21 = sshll.u32 %s2020_s27, 11 }
  0x17   : > { %1767 = vmatprep.mubr.msk.bf16.mxu0 %vm387_vm0, %v1924_v4  ;;  %s301_s16 = scalar_lea.vmem %s2526_s0, %s1595_s10  ;;  %v1926_v10 = vld [vmem:[%s2527_s1 + $0x10] sm:$0xff]   ;;  %v314_v11 = vld [vmem:[%s2528_s2 + $0x8] sm:$0xff]  ;;  %v508_v13 = vld [vmem:[%s2530_s4 + $0x78] sm:$0xff]  ;;  %s2473_s10 = scalar_lea.hbm %s2533_s7, %s1628_s21 }
  0x18   : > { %v1923_v7 = vld [vmem:[%s301_s16] sm:$0xff]   ;;  %v507_v14 = vld [vmem:[%s2530_s4 + $0x70] sm:$0xff]  ;;  %v1927_v15 = vld [vmem:[%s2527_s1 + $0x18] sm:$0xff]   ;;  %s2481_s27 = scalar_lea.sflag [#allocation3], %s291_s19  ;;  %p1955_p0 = pneg %p1954_p13 }
  0x19   : > { %1765 = vmatprep.subr.bf16.mxu0 %v1923_v7  ;;  %v506_v16 = vld [vmem:[%s2530_s4 + $0x68] sm:$0xff]  ;;  %v505_v17 = vld [vmem:[%s2530_s4 + $0x60] sm:$0xff]  ;;  %v504_v18 = vld [vmem:[%s2530_s4 + $0x58] sm:$0xff]  ;;  %s1956_s16 = sshll.u32 %s2031_s15, 4  ;;  %s1957_s16 = int_to_ptr.vmem [resolvable:$false] %s1956_s16 }
  0x1a   : > { %358 = vperm.xlu0 %1921, %v320_v3   ;;  %348 = vperm.xlu1 %1922, %v318_v5   ;;  %v503_v19 = vld [vmem:[%s2530_s4 + $0x50] sm:$0xff]  ;;  %v502_v20 = vld [vmem:[%s2530_s4 + $0x48] sm:$0xff]  ;;  %v501_v21 = vld [vmem:[%s2530_s4 + $0x40] sm:$0xff]  ;;  %s1958_s17 = scalar_lea.vmem %s1957_s16, 4096  ;;  %p1959_p1 = scmp.lt.s32.totalorder %s2475_s23, %s1957_s16 }
  0x1b   : > { %1766 = vmatpush3.bf16.msra.mxu0 %v1923_v7  ;;  %v500_v22 = vld [vmem:[%s2530_s4 + $0x38] sm:$0xff]  ;;  %v499_v23 = vld [vmem:[%s2530_s4 + $0x30] sm:$0xff]  ;;  %v498_v24 = vld [vmem:[%s2530_s4 + $0x28] sm:$0xff]  ;;  %p1960_p2 = scmp.lt.s32.totalorder %s1958_s17, %s1952_s12 }
  0x1c   : > { %v497_v25 = vld [vmem:[%s2530_s4 + $0x20] sm:$0xff]  ;;  %v496_v26 = vld [vmem:[%s2530_s4 + $0x18] sm:$0xff]  ;;  %v495_v27 = vld [vmem:[%s2530_s4 + $0x10] sm:$0xff] }
  0x1d   : > { %v494_v28 = vld [vmem:[%s2530_s4 + $0x8] sm:$0xff]  ;;  %v493_v29 = vld [vmem:[%s2530_s4] sm:$0xff]  ;;  %v810_v32 = vld [vmem:[%s2532_s6 + $0x18] sm:$0xff]  ;;  %p1961_p3 = por %p1960_p2, %p1959_p1 }
  0x1e   : > { %338 = vperm.xlu1 %1922, %v316_v6   ;;  %333 = vperm.xlu0 %1921, %v315_v8   ;;  %v808_v30 = vld [vmem:[%s2532_s6 + $0x8] sm:$0xff]  ;;  %v807_v31 = vld [vmem:[%s2532_s6] sm:$0xff]  ;;  %v809_v33 = vld [vmem:[%s2532_s6 + $0x10] sm:$0xff] }
  0x1f   : > { %1768 = vmatmul.mubr.msk.bf16.vlgmr.msra.gmra.mxu0 %vm387_vm0, %v1925_v9  ;;  %v812_v34 = vld [vmem:[%s2532_s6 + $0x28] sm:$0xff]  ;;  %v811_v35 = vld [vmem:[%s2532_s6 + $0x20] sm:$0xff]  ;;  %v814_v36 = vld [vmem:[%s2532_s6 + $0x38] sm:$0xff]  ;;  %p1962_p5 = pnand %p1961_p3, %p1955_p0 }
  0x20   : > { %1771 = vmatprep.mubr.msk.bf16.mxu0 %vm387_vm0, %v1926_v10  ;;  %v813_v37 = vld [vmem:[%s2532_s6 + $0x30] sm:$0xff]  ;;  %v816_v38 = vld [vmem:[%s2532_s6 + $0x48] sm:$0xff]  ;;  %v815_v39 = vld [vmem:[%s2532_s6 + $0x40] sm:$0xff] }
  0x21   : > { %v818_v40 = vld [vmem:[%s2532_s6 + $0x58] sm:$0xff]  ;;  %v817_v41 = vld [vmem:[%s2532_s6 + $0x50] sm:$0xff]  ;;  %v820_v42 = vld [vmem:[%s2532_s6 + $0x68] sm:$0xff] }
  0x22   : > { %328 = vperm.xlu1 %1922, %v314_v11   ;;  %323 = vperm.xlu0 %1921, %v313_v12   ;;  %v819_v43 = vld [vmem:[%s2532_s6 + $0x60] sm:$0xff]  ;;  %v822_v44 = vld [vmem:[%s2532_s6 + $0x78] sm:$0xff]  ;;  %v821_v45 = vld [vmem:[%s2532_s6 + $0x70] sm:$0xff] }
  0x23   : > { %v824_v46 = vld [vmem:[%s2532_s6 + $0x88] sm:$0xff]  ;;  %v823_v47 = vld [vmem:[%s2532_s6 + $0x80] sm:$0xff]  ;;  %v826_v48 = vld [vmem:[%s2532_s6 + $0x98] sm:$0xff] }
  0x24   : > { %v825_v49 = vld [vmem:[%s2532_s6 + $0x90] sm:$0xff]  ;;  %v828_v50 = vld [vmem:[%s2532_s6 + $0xa8] sm:$0xff]  ;;  %v827_v51 = vld [vmem:[%s2532_s6 + $0xa0] sm:$0xff] }
  0x25   : > { %v830_v52 = vld [vmem:[%s2532_s6 + $0xb8] sm:$0xff]  ;;  %v829_v53 = vld [vmem:[%s2532_s6 + $0xb0] sm:$0xff]  ;;  %v832_v54 = vld [vmem:[%s2532_s6 + $0xc8] sm:$0xff] }
  0x26   : > { %586 = vperm.xlu1 %1922, %v508_v13   ;;  %581 = vperm.xlu0 %1921, %v507_v14   ;;  %v831_v55 = vld [vmem:[%s2532_s6 + $0xc0] sm:$0xff]  ;;  %v834_v56 = vld [vmem:[%s2532_s6 + $0xd8] sm:$0xff]  ;;  %v833_v57 = vld [vmem:[%s2532_s6 + $0xd0] sm:$0xff] }
  0x27   : > { %1772 = vmatmul.mubr.msk.bf16.gmra.mxu0 %vm387_vm0, %v1927_v15  ;;  %v836_v58 = vld [vmem:[%s2532_s6 + $0xe8] sm:$0xff]  ;;  %v835_v59 = vld [vmem:[%s2532_s6 + $0xe0] sm:$0xff]  ;;  %v838_v60 = vld [vmem:[%s2532_s6 + $0xf8] sm:$0xff] }
  0x28   : > { %v837_v61 = vld [vmem:[%s2532_s6 + $0xf0] sm:$0xff]  ;;  %v1928_v62 = vld [vmem:[%s2529_s3] sm:$0xff]  }
  0x29   : > { %1783 = vmatprep.mubr.msk.bf16.mxu1 %vm629_vm1, %v1928_v62 }
  0x2a   : > { %576 = vperm.xlu1 %1922, %v506_v16   ;;  %571 = vperm.xlu0 %1921, %v505_v17  }
  0x2e   : > { %566 = vperm.xlu1 %1922, %v504_v18   ;;  %561 = vperm.xlu0 %1921, %v503_v19  }
  0x32   : > { %556 = vperm.xlu1 %1922, %v502_v20   ;;  %551 = vperm.xlu0 %1921, %v501_v21  }
  0x36   : > { %546 = vperm.xlu1 %1922, %v500_v22   ;;  %541 = vperm.xlu0 %1921, %v499_v23  }
  0x3a   : > { %536 = vperm.xlu1 %1922, %v498_v24   ;;  %531 = vperm.xlu0 %1921, %v497_v25  }
  0x3e   : > { %526 = vperm.xlu1 %1922, %v496_v26   ;;  %521 = vperm.xlu0 %1921, %v495_v27  }
  0x42   : > { %516 = vperm.xlu1 %1922, %v494_v28   ;;  %511 = vperm.xlu0 %1921, %v493_v29  }
  0x46   : > { %846 = vperm.xlu1 %1922, %v808_v30   ;;  %841 = vperm.xlu0 %1921, %v807_v31  }
  0x4a   : > { %856 = vperm.xlu1 %1922, %v810_v32   ;;  %851 = vperm.xlu0 %1921, %v809_v33  }
  0x4e   : > { %866 = vperm.xlu1 %1922, %v812_v34   ;;  %861 = vperm.xlu0 %1921, %v811_v35   ;;  %v1929_v35 = vld [vmem:[%s2529_s3 + $0x8] sm:$0xff]  }
  0x52   : > { %876 = vperm.xlu1 %1922, %v814_v36   ;;  %871 = vperm.xlu0 %1921, %v813_v37   ;;  %v1930_v36 = vld [vmem:[%s2529_s3 + $0x10] sm:$0xff]   ;;  %v1931_v37 = vld [vmem:[%s2529_s3 + $0x18] sm:$0xff]  }
  0x56   : > { %886 = vperm.xlu1 %1922, %v816_v38   ;;  %881 = vperm.xlu0 %1921, %v815_v39   ;;  %v1932_v38 = vld [vmem:[%s2529_s3 + $0x20] sm:$0xff]   ;;  %v1933_v39 = vld [vmem:[%s2529_s3 + $0x28] sm:$0xff]  }
  0x5a   : > { %896 = vperm.xlu1 %1922, %v818_v40   ;;  %891 = vperm.xlu0 %1921, %v817_v41   ;;  %v1934_v40 = vld [vmem:[%s2529_s3 + $0x30] sm:$0xff]   ;;  %v1935_v41 = vld [vmem:[%s2529_s3 + $0x38] sm:$0xff]  }
  0x5e   : > { %906 = vperm.xlu1 %1922, %v820_v42   ;;  %901 = vperm.xlu0 %1921, %v819_v43   ;;  %v1936_v42 = vld [vmem:[%s2531_s5] sm:$0xff]   ;;  %v1937_v43 = vld [vmem:[%s2531_s5 + $0x50] sm:$0xff]  }
  0x5f   : > { %1815 = vmatprep.mubr.bf16.mxu0 %v1936_v42 }
  0x62   : > { %916 = vperm.xlu1 %1922, %v822_v44   ;;  %911 = vperm.xlu0 %1921, %v821_v45  }
  0x66   : > { %926 = vperm.xlu1 %1922, %v824_v46   ;;  %921 = vperm.xlu0 %1921, %v823_v47  }
  0x6a   : > { %936 = vperm.xlu1 %1922, %v826_v48   ;;  %931 = vperm.xlu0 %1921, %v825_v49  }
  0x6e   : > { %946 = vperm.xlu1 %1922, %v828_v50   ;;  %941 = vperm.xlu0 %1921, %v827_v51  }
  0x72   : > { %956 = vperm.xlu1 %1922, %v830_v52   ;;  %951 = vperm.xlu0 %1921, %v829_v53  }
  0x76   : > { %966 = vperm.xlu1 %1922, %v832_v54   ;;  %961 = vperm.xlu0 %1921, %v831_v55  }
  0x7a   : > { %976 = vperm.xlu1 %1922, %v834_v56   ;;  %971 = vperm.xlu0 %1921, %v833_v57  }
  0x7e   : > { %986 = vperm.xlu1 %1922, %v836_v58   ;;  %981 = vperm.xlu0 %1921, %v835_v59  }
  0x82   : > { %996 = vperm.xlu1 %1922, %v838_v60   ;;  %991 = vperm.xlu0 %1921, %v837_v61  }
  0x91   : > { %v344_v63 = vpop.permute.xlu1 %343  ;;  %v354_v1 = vpop.permute.xlu0 %353 }
  0x95   : > { %v349_v4 = vpop.permute.xlu1 %348  ;;  %v359_v6 = vpop.permute.xlu0 %358 }
  0x99   : > { %v339_v10 = vpop.permute.xlu1 %338  ;;  %v334_v14 = vpop.permute.xlu0 %333 }
  0x9d   : > { %v329_v24 = vpop.permute.xlu1 %328  ;;  %v324_v28 = vpop.permute.xlu0 %323 }
  0xa1   : > { %v587_v48 = vpop.permute.xlu1 %586  ;;  %v582_v50 = vpop.permute.xlu0 %581 }
  0xa5   : > { %v577_v53 = vpop.permute.xlu1 %576  ;;  %v572_v55 = vpop.permute.xlu0 %571 }
  0xa9   : > { %v567_v58 = vpop.permute.xlu1 %566  ;;  %v562_v60 = vpop.permute.xlu0 %561 }
  0xdf   : > { %v1769_v0 = vpop.f32.mrf.mxu0 }
  0xe0   : > { %v443_v20 = vadd.f32 %v1769_v0, %v334_v14 }
  0xe1   : > { %v434_v2 = vpop.f32.mrf.mxu0 }
  0xe2   : > { %v467_v29 = vmax.f32 %v443_v20, 0.0  ;;  %v435_v30 = vadd.f32 %v434_v2, %v324_v28  ;;  %v552_v2 = vpop.permute.xlu0 %551 }
  0xe3   : > { %v1770_v3 = vpop.f32.mrf.mxu0 }
  0xe4   : > { %v446_v16 = vadd.f32 %v1770_v3, %v339_v10  ;;  %v465_v33 = vmax.f32 %v435_v30, 0.0 }
  0xe5   : > { %v437_v5 = vpop.f32.mrf.mxu0 }
  0xe6   : > { %v468_v25 = vmax.f32 %v446_v16, 0.0  ;;  %v438_v26 = vadd.f32 %v437_v5, %v329_v24  ;;  %v542_v16 = vpop.permute.xlu0 %541 }
  0xe7   : > { %v1773_v7 = vpop.f32.mrf.mxu0 }
  0xe8   : > { %v459_v9 = vadd.f32 %v1773_v7, %v354_v1  ;;  %v474_v31 = vpack.c.bf16 %v468_v25, %v467_v29  ;;  %v466_v32 = vmax.f32 %v438_v26, 0.0 }
  0xe9   : > { %v450_v8 = vpop.f32.mrf.mxu0 }
  0xea   : > { %v451_v12 = vadd.f32 %v450_v8, %v344_v63  ;;  %v471_v17 = vmax.f32 %v459_v9, 0.0  ;;  %v473_v34 = vpack.c.bf16 %v466_v32, %v465_v33  ;;  %v557_v63 = vpop.permute.xlu1 %556  ;;  %v532_v26 = vpop.permute.xlu0 %531 }
  0xeb   : > { %v1774_v11 = vpop.f32.mrf.mxu0 }
  0xec   : > { %v462_v13 = vadd.f32 %v1774_v11, %v359_v6  ;;  %v469_v21 = vmax.f32 %v451_v12, 0.0 }
  0xed   : > { %v453_v15 = vpop.f32.mrf.mxu0 }
  0xee   : > { %v472_v18 = vmax.f32 %v462_v13, 0.0  ;;  %v454_v19 = vadd.f32 %v453_v15, %v349_v4  ;;  %v547_v11 = vpop.permute.xlu1 %546 }
  0xf0   : > { %v470_v22 = vmax.f32 %v454_v19, 0.0  ;;  %v476_v23 = vpack.c.bf16 %v472_v18, %v471_v17 }
  0xf2   : > { %v475_v27 = vpack.c.bf16 %v470_v22, %v469_v21  ;;  %1775 = vmatprep.subr.bf16.mxu1 %v476_v23  ;;  %v537_v22 = vpop.permute.xlu1 %536 }
  0xf3   : > { %1776 = vmatpush3.bf16.msra.mxu1 %v476_v23 }
  0xf4   : > { %1777 = vmatprep.subr.bf16.mxu1 %v475_v27 }
  0xf6   : > { %v527_v32 = vpop.permute.xlu1 %526 }
  0xf7   : > { %1778 = vmatpush3.bf16.msra.mxu1 %v475_v27 }
  0xf8   : > { %1779 = vmatprep.subr.bf16.mxu1 %v474_v31 }
  0xfb   : > { %1780 = vmatpush3.bf16.msra.mxu1 %v474_v31 }
  0xfc   : > { %1781 = vmatprep.subr.bf16.mxu1 %v473_v34 }
  0xff   : > { %1782 = vmatpush3.bf16.msra.mxu1 %v473_v34 }
 0x102   : > { %1784 = vmatmul.mubr.msk.bf16.vlgmr.msra.gmra.mxu1 %vm629_vm1, %v1929_v35  ;;  %v522_v35 = vpop.permute.xlu0 %521 }
 0x103   : > { %1787 = vmatprep.mubr.msk.bf16.mxu1 %vm629_vm1, %v1930_v36 }
 0x10a   : > { %1788 = vmatmul.mubr.msk.bf16.gmra.mxu1 %vm629_vm1, %v1931_v37 }
 0x10b   : > { %1791 = vmatprep.mubr.msk.bf16.mxu1 %vm629_vm1, %v1932_v38 }
 0x112   : > { %1792 = vmatmul.mubr.msk.bf16.gmra.mxu1 %vm629_vm1, %v1933_v39 }
 0x113   : > { %1795 = vmatprep.mubr.msk.bf16.mxu1 %vm629_vm1, %v1934_v40 }
 0x11a   : > { %1796 = vmatmul.mubr.msk.bf16.gmra.mxu1 %vm629_vm1, %v1935_v41  ;;  %v517_v41 = vpop.permute.xlu1 %516 }
 0x11b   : > { %1835 = vmatprep.mubr.bf16.mxu1 %v1937_v43 }
 0x1c2   : > { %v2356_v44 = vpop.f32.mrf.mxu1 }
 0x1c3   : > { %v697_v39 = vadd.f32 %v2356_v44, %v522_v35 }
 0x1c4   : > { %v2358_v45 = vpop.f32.mrf.mxu1 }
 0x1c6   : > { %v2360_v46 = vpop.f32.mrf.mxu1 }
 0x1c7   : > { %v700_v36 = vadd.f32 %v2360_v46, %v527_v32 }
 0x1c8   : > { %v2362_v47 = vpop.f32.mrf.mxu1 }
 0x1c9   : > { %v754_v42 = vmax.f32 %v700_v36, 0.0  ;;  %v692_v43 = vadd.f32 %v2362_v47, %v517_v41  ;;  %v1938_v47 = vld [vmem:[%s2531_s5 + $0x8] sm:$0xff]  }
 0x1ca   : > { %v1789_v49 = vpop.f32.mrf.mxu1 }
 0x1cb   : > { %v713_v27 = vadd.f32 %v1789_v49, %v542_v16  ;;  %v512_v49 = vpop.permute.xlu0 %511 }
 0x1cc   : > { %v704_v51 = vpop.f32.mrf.mxu1  ;;  %v689_v46 = vadd.f32 %v2358_v45, %v512_v49  ;;  %v1939_v45 = vld [vmem:[%s2531_s5 + $0x58] sm:$0xff]  }
 0x1cd   : > { %v757_v33 = vmax.f32 %v713_v27, 0.0  ;;  %v705_v34 = vadd.f32 %v704_v51, %v532_v26 }
 0x1ce   : > { %v1790_v52 = vpop.f32.mrf.mxu1  ;;  %v751_v44 = vmax.f32 %v689_v46, 0.0 }
 0x1cf   : > { %v716_v23 = vadd.f32 %v1790_v52, %v547_v11  ;;  %v755_v40 = vmax.f32 %v705_v34, 0.0  ;;  %v752_v52 = vmax.f32 %v692_v43, 0.0 }
 0x1d0   : > { %v707_v54 = vpop.f32.mrf.mxu1 }
 0x1d1   : > { %v758_v29 = vmax.f32 %v716_v23, 0.0  ;;  %v708_v30 = vadd.f32 %v707_v54, %v537_v22  ;;  %v1940_v54 = vld [vmem:[%s2531_s5 + $0x10] sm:$0xff]  }
 0x1d2   : > { %v1793_v56 = vpop.f32.mrf.mxu1 }
 0x1d3   : > { %v729_v12 = vadd.f32 %v1793_v56, %v562_v60  ;;  %v770_v37 = vpack.c.bf16 %v758_v29, %v757_v33  ;;  %v756_v38 = vmax.f32 %v708_v30, 0.0  ;;  %v1942_v56 = vld [vmem:[%s2531_s5 + $0x18] sm:$0xff]   ;;  %v1946_v60 = vld [vmem:[%s2531_s5 + $0x28] sm:$0xff]  }
 0x1d4   : > { %v720_v57 = vpop.f32.mrf.mxu1 }
 0x1d5   : > { %v761_v20 = vmax.f32 %v729_v12, 0.0  ;;  %v721_v21 = vadd.f32 %v720_v57, %v552_v2  ;;  %v1943_v57 = vld [vmem:[%s2531_s5 + $0x68] sm:$0xff]   ;;  %v847_v2 = vpop.permute.xlu1 %846 }
 0x1d6   : > { %v1794_v59 = vpop.f32.mrf.mxu1 }
 0x1d7   : > { %v732_v7 = vadd.f32 %v1794_v59, %v567_v58  ;;  %v759_v28 = vmax.f32 %v721_v21, 0.0  ;;  %v1944_v58 = vld [vmem:[%s2531_s5 + $0x20] sm:$0xff]   ;;  %v1945_v59 = vld [vmem:[%s2531_s5 + $0x70] sm:$0xff]  }
 0x1d8   : > { %v723_v61 = vpop.f32.mrf.mxu1 }
 0x1d9   : > { %v762_v17 = vmax.f32 %v732_v7, 0.0  ;;  %v724_v18 = vadd.f32 %v723_v61, %v557_v63  ;;  %v1947_v61 = vld [vmem:[%s2531_s5 + $0x78] sm:$0xff]  }
 0x1da   : > { %v1797_v62 = vpop.f32.mrf.mxu1  ;;  %v1949_v63 = vld [vmem:[%s2531_s5 + $0x38] sm:$0xff]  }
 0x1db   : > { %v745_v1 = vadd.f32 %v1797_v62, %v582_v50  ;;  %v772_v24 = vpack.c.bf16 %v762_v17, %v761_v20  ;;  %v760_v25 = vmax.f32 %v724_v18, 0.0  ;;  %v753_v50 = vmax.f32 %v697_v39, 0.0  ;;  %v1948_v62 = vld [vmem:[%s2531_s5 + $0x30] sm:$0xff]  }
 0x1dc   : > { %v736_v0 = vpop.f32.mrf.mxu1 }
 0x1dd   : > { %v737_v4 = vadd.f32 %v736_v0, %v572_v55  ;;  %v765_v8 = vmax.f32 %v745_v1, 0.0  ;;  %v771_v31 = vpack.c.bf16 %v760_v25, %v759_v28  ;;  %v768_v51 = vpack.c.bf16 %v754_v42, %v753_v50  ;;  %v1941_v55 = vld [vmem:[%s2531_s5 + $0x60] sm:$0xff]   ;;  %v1951_v1 = vld [vmem:[%s2531_s5 + $0x48] sm:$0xff]  }
 0x1de   : > { %v1798_v3 = vpop.f32.mrf.mxu1  ;;  %v1950_v0 = vld [vmem:[%s2531_s5 + $0x40] sm:$0xff]  }
 0x1df   : > { %v748_v5 = vadd.f32 %v1798_v3, %v587_v48  ;;  %v763_v13 = vmax.f32 %v737_v4, 0.0  ;;  %v769_v48 = vpack.c.bf16 %v756_v38, %v755_v40  ;;  %v842_v3 = vpop.permute.xlu0 %841  ;;  %v857_v4 = vpop.permute.xlu1 %856 }
 0x1e0   : > { %v739_v6 = vpop.f32.mrf.mxu1 }
 0x1e1   : > { %v766_v9 = vmax.f32 %v748_v5, 0.0  ;;  %v740_v10 = vadd.f32 %v739_v6, %v577_v53  ;;  %v767_v53 = vpack.c.bf16 %v752_v52, %v751_v44 }
 0x1e3   : > { %v774_v14 = vpack.c.bf16 %v766_v9, %v765_v8  ;;  %v764_v15 = vmax.f32 %v740_v10, 0.0  ;;  %v852_v5 = vpop.permute.xlu0 %851  ;;  %v2410_v6 = vpop.permute.xlu1 %866 }
 0x1e5   : > { %v773_v19 = vpack.c.bf16 %v764_v15, %v763_v13  ;;  %1799 = vmatprep.subr.bf16.mxu0 %v774_v14  ;;  %1847 = vmatprep.subr.bf16.mxu1 %v774_v14 }
 0x1e6   : > { %1800 = vmatpush3.bf16.msra.mxu0 %v774_v14  ;;  %1855 = vmatpush3.bf16.msra.mxu1 %v774_v14 }
 0x1e7   : > { %1801 = vmatprep.subr.bf16.mxu0 %v773_v19  ;;  %1848 = vmatprep.subr.bf16.mxu1 %v773_v19  ;;  %v862_v7 = vpop.permute.xlu0 %861  ;;  %v877_v8 = vpop.permute.xlu1 %876 }
 0x1ea   : > { %1802 = vmatpush3.bf16.msra.mxu0 %v773_v19  ;;  %1856 = vmatpush3.bf16.msra.mxu1 %v773_v19 }
 0x1eb   : > { %1803 = vmatprep.subr.bf16.mxu0 %v772_v24  ;;  %1849 = vmatprep.subr.bf16.mxu1 %v772_v24  ;;  %v872_v9 = vpop.permute.xlu0 %871  ;;  %v2412_v10 = vpop.permute.xlu1 %886 }
 0x1ee   : > { %1804 = vmatpush3.bf16.msra.mxu0 %v772_v24  ;;  %1857 = vmatpush3.bf16.msra.mxu1 %v772_v24 }
 0x1ef   : > { %1805 = vmatprep.subr.bf16.mxu0 %v771_v31  ;;  %1850 = vmatprep.subr.bf16.mxu1 %v771_v31  ;;  %v2414_v11 = vpop.permute.xlu0 %881  ;;  %v2416_v12 = vpop.permute.xlu1 %896 }
 0x1f2   : > { %1806 = vmatpush3.bf16.msra.mxu0 %v771_v31  ;;  %1858 = vmatpush3.bf16.msra.mxu1 %v771_v31 }
 0x1f3   : > { %1807 = vmatprep.subr.bf16.mxu0 %v770_v37  ;;  %1851 = vmatprep.subr.bf16.mxu1 %v770_v37  ;;  %v2418_v13 = vpop.permute.xlu0 %891  ;;  %v2420_v14 = vpop.permute.xlu1 %906 }
 0x1f6   : > { %1808 = vmatpush3.bf16.msra.mxu0 %v770_v37  ;;  %1859 = vmatpush3.bf16.msra.mxu1 %v770_v37 }
 0x1f7   : > { %1809 = vmatprep.subr.bf16.mxu0 %v769_v48  ;;  %1852 = vmatprep.subr.bf16.mxu1 %v769_v48  ;;  %v2422_v15 = vpop.permute.xlu0 %901  ;;  %v2424_v16 = vpop.permute.xlu1 %916 }
 0x1fa   : > { %1810 = vmatpush3.bf16.msra.mxu0 %v769_v48  ;;  %1860 = vmatpush3.bf16.msra.mxu1 %v769_v48 }
 0x1fb   : > { %1811 = vmatprep.subr.bf16.mxu0 %v768_v51  ;;  %1853 = vmatprep.subr.bf16.mxu1 %v768_v51  ;;  %v2426_v17 = vpop.permute.xlu0 %911  ;;  %v2428_v18 = vpop.permute.xlu1 %926 }
 0x1fe   : > { %1812 = vmatpush3.bf16.msra.mxu0 %v768_v51  ;;  %1861 = vmatpush3.bf16.msra.mxu1 %v768_v51 }
 0x1ff   : > { %1813 = vmatprep.subr.bf16.mxu0 %v767_v53  ;;  %1854 = vmatprep.subr.bf16.mxu1 %v767_v53  ;;  %v2430_v19 = vpop.permute.xlu0 %921  ;;  %v2432_v20 = vpop.permute.xlu1 %936 }
 0x202   : > { %1814 = vmatpush3.bf16.msra.mxu0 %v767_v53  ;;  %1862 = vmatpush3.bf16.msra.mxu1 %v767_v53 }
 0x203   : > { %v2434_v21 = vpop.permute.xlu0 %931  ;;  %v947_v22 = vpop.permute.xlu1 %946 }
 0x205   : > { %1816 = vmatmul.mubr.bf16.vlgmr.msra.gmra.mxu0 %v1938_v47  ;;  %1836 = vmatmul.mubr.bf16.vlgmr.msra.gmra.mxu1 %v1939_v45 }
 0x206   : > { %1819 = vmatprep.mubr.bf16.mxu0 %v1940_v54  ;;  %1839 = vmatprep.mubr.bf16.mxu1 %v1941_v55 }
 0x207   : > { %v942_v23 = vpop.permute.xlu0 %941  ;;  %v957_v24 = vpop.permute.xlu1 %956 }
 0x20b   : > { %v952_v25 = vpop.permute.xlu0 %951  ;;  %v967_v28 = vpop.permute.xlu1 %966 }
 0x20d   : > { %1820 = vmatmul.mubr.bf16.gmra.mxu0 %v1942_v56  ;;  %1840 = vmatmul.mubr.bf16.gmra.mxu1 %v1943_v57 }
 0x20e   : > { %1823 = vmatprep.mubr.bf16.mxu0 %v1944_v58  ;;  %1843 = vmatprep.mubr.bf16.mxu1 %v1945_v59 }
 0x20f   : > { %v962_v29 = vpop.permute.xlu0 %961  ;;  %v977_v42 = vpop.permute.xlu1 %976 }
 0x213   : > { %v972_v43 = vpop.permute.xlu0 %971  ;;  %v987_v56 = vpop.permute.xlu1 %986 }
 0x215   : > { %1824 = vmatmul.mubr.bf16.gmra.mxu0 %v1946_v60  ;;  %1844 = vmatmul.mubr.bf16.gmra.mxu1 %v1947_v61 }
 0x216   : > { %1827 = vmatprep.mubr.bf16.mxu0 %v1948_v62 }
 0x217   : > { %v982_v57 = vpop.permute.xlu0 %981 }
 0x21d   : > { %1828 = vmatmul.mubr.bf16.gmra.mxu0 %v1949_v63 }
 0x21e   : > { %1831 = vmatprep.mubr.bf16.mxu0 %v1950_v0 }
 0x225   : > { %1832 = vmatmul.mubr.bf16.gmra.mxu0 %v1951_v1 }
 0x2c5   : > { %v1817_v26 = vpop.f32.mrf.mxu0  ;;  %v1837_v27 = vpop.f32.mrf.mxu1 }
 0x2c6   : > { %v1138_v34 = vadd.f32 %v1817_v26, %v852_v5  ;;  %v1218_v35 = vadd.f32 %v1837_v27, %v952_v25  ;;  %v997_v26 = vpop.permute.xlu1 %996 }
 0x2c7   : > { %v1129_v30 = vpop.f32.mrf.mxu0  ;;  %v1209_v31 = vpop.f32.mrf.mxu1 }
 0x2c8   : > { %v1130_v38 = vadd.f32 %v1129_v30, %v842_v3  ;;  %v1210_v39 = vadd.f32 %v1209_v31, %v942_v23 }
 0x2c9   : > { %v1818_v32 = vpop.f32.mrf.mxu0  ;;  %v1838_v33 = vpop.f32.mrf.mxu1 }
 0x2ca   : > { %v1141_v36 = vadd.f32 %v1818_v32, %v857_v4  ;;  %v1221_v37 = vadd.f32 %v1838_v33, %v957_v24 }
 0x2cb   : > { %v1132_v40 = vpop.f32.mrf.mxu0  ;;  %v1212_v41 = vpop.f32.mrf.mxu1 }
 0x2cc   : > { %v1637_v48 = vpack.c.bf16 %v1141_v36, %v1138_v34  ;;  %v1687_v49 = vpack.c.bf16 %v1221_v37, %v1218_v35  ;;  %v1133_v50 = vadd.f32 %v1132_v40, %v847_v2  ;;  %v1213_v46 = vadd.f32 %v1212_v41, %v947_v22 }
 0x2cd   : > { %v1821_v51 = vpop.f32.mrf.mxu0  ;;  %v1841_v52 = vpop.f32.mrf.mxu1 }
 0x2ce   : > { %1709 = vst [vmem:[%s2439_s22 + $0x8] sm:$0xff] %v1637_v48   ;;  %1719 = vst [vmem:[%s2439_s22 + $0x58] sm:$0xff] %v1687_v49   ;;  %v1632_v44 = vpack.c.bf16 %v1133_v50, %v1130_v38  ;;  %v1682_v53 = vpack.c.bf16 %v1213_v46, %v1210_v39  ;;  %v1154_v58 = vadd.f32 %v1821_v51, %v872_v9 }
 0x2cf   : > { %v1145_v47 = vpop.f32.mrf.mxu0  ;;  %v1225_v45 = vpop.f32.mrf.mxu1  ;;  %v1234_v59 = vadd.f32 %v1841_v52, %v972_v43 }
 0x2d0   : > { %1633 = vst [vmem:[%s2439_s22] sm:$0xff] %v1632_v44   ;;  %1718 = vst [vmem:[%s2439_s22 + $0x50] sm:$0xff] %v1682_v53   ;;  %v1146_v62 = vadd.f32 %v1145_v47, %v862_v7  ;;  %v1226_v63 = vadd.f32 %v1225_v45, %v962_v29  ;;  %v992_v7 = vpop.permute.xlu0 %991 }
 0x2d1   : > { %v1822_v54 = vpop.f32.mrf.mxu0  ;;  %v1842_v55 = vpop.f32.mrf.mxu1 }
 0x2d2   : > { %v1157_v60 = vadd.f32 %v1822_v54, %v877_v8  ;;  %v1237_v61 = vadd.f32 %v1842_v55, %v977_v42 }
 0x2d3   : > { %v1148_v0 = vpop.f32.mrf.mxu0  ;;  %v1228_v1 = vpop.f32.mrf.mxu1 }
 0x2d4   : > { %v1647_v2 = vpack.c.bf16 %v1157_v60, %v1154_v58  ;;  %v1697_v3 = vpack.c.bf16 %v1237_v61, %v1234_v59  ;;  %v1149_v4 = vadd.f32 %v1148_v0, %v2410_v6  ;;  %v1229_v5 = vadd.f32 %v1228_v1, %v967_v28 }
 0x2d5   : > { %v1825_v22 = vpop.f32.mrf.mxu0  ;;  %v1845_v23 = vpop.f32.mrf.mxu1 }
 0x2d6   : > { %1711 = vst [vmem:[%s2439_s22 + $0x18] sm:$0xff] %v1647_v2   ;;  %1721 = vst [vmem:[%s2439_s22 + $0x68] sm:$0xff] %v1697_v3   ;;  %v1642_v24 = vpack.c.bf16 %v1149_v4, %v1146_v62  ;;  %v1692_v9 = vpack.c.bf16 %v1229_v5, %v1226_v63  ;;  %v1170_v30 = vadd.f32 %v1825_v22, %v2418_v13 }
 0x2d7   : > { %v1161_v25 = vpop.f32.mrf.mxu0  ;;  %v1241_v8 = vpop.f32.mrf.mxu1  ;;  %v1250_v6 = vadd.f32 %v1845_v23, %v992_v7 }
 0x2d8   : > { %1710 = vst [vmem:[%s2439_s22 + $0x10] sm:$0xff] %v1642_v24   ;;  %1720 = vst [vmem:[%s2439_s22 + $0x60] sm:$0xff] %v1692_v9   ;;  %v1162_v32 = vadd.f32 %v1161_v25, %v2414_v11  ;;  %v1242_v33 = vadd.f32 %v1241_v8, %v982_v57 }
 0x2d9   : > { %v1826_v27 = vpop.f32.mrf.mxu0  ;;  %v1846_v29 = vpop.f32.mrf.mxu1 }
 0x2da   : > { %v1173_v28 = vadd.f32 %v1826_v27, %v2416_v12  ;;  %v1253_v31 = vadd.f32 %v1846_v29, %v997_v26 }
 0x2db   : > { %v1164_v34 = vpop.f32.mrf.mxu0  ;;  %v1244_v35 = vpop.f32.mrf.mxu1 }
 0x2dc   : > { %v1657_v36 = vpack.c.bf16 %v1173_v28, %v1170_v30  ;;  %v1707_v37 = vpack.c.bf16 %v1253_v31, %v1250_v6  ;;  %v1165_v38 = vadd.f32 %v1164_v34, %v2412_v10  ;;  %v1245_v39 = vadd.f32 %v1244_v35, %v987_v56 }
 0x2dd   : > { %v1829_v40 = vpop.f32.mrf.mxu0 }
 0x2de   : > { %1713 = vst [vmem:[%s2439_s22 + $0x28] sm:$0xff] %v1657_v36   ;;  %1723 = vst [vmem:[%s2439_s22 + $0x78] sm:$0xff] %v1707_v37   ;;  %v1652_v13 = vpack.c.bf16 %v1165_v38, %v1162_v32  ;;  %v1702_v12 = vpack.c.bf16 %v1245_v39, %v1242_v33  ;;  %v1186_v42 = vadd.f32 %v1829_v40, %v2426_v17 }
 0x2df   : > { %v1177_v41 = vpop.f32.mrf.mxu0 }
 0x2e0   : > { %1712 = vst [vmem:[%s2439_s22 + $0x20] sm:$0xff] %v1652_v13   ;;  %1722 = vst [vmem:[%s2439_s22 + $0x70] sm:$0xff] %v1702_v12   ;;  %v1178_v10 = vadd.f32 %v1177_v41, %v2422_v15 }
 0x2e1   : > { %v1830_v11 = vpop.f32.mrf.mxu0 }
 0x2e2   : > { %v1189_v43 = vadd.f32 %v1830_v11, %v2424_v16 }
 0x2e3   : > { %v1180_v48 = vpop.f32.mrf.mxu0 }
 0x2e4   : > { %v1667_v49 = vpack.c.bf16 %v1189_v43, %v1186_v42  ;;  %v1181_v50 = vadd.f32 %v1180_v48, %v2420_v14 }
 0x2e5   : > { %v1833_v46 = vpop.f32.mrf.mxu0 }
 0x2e6   : > { %1715 = vst [vmem:[%s2439_s22 + $0x38] sm:$0xff] %v1667_v49   ;;  %v1662_v51 = vpack.c.bf16 %v1181_v50, %v1178_v10  ;;  %v1202_v53 = vadd.f32 %v1833_v46, %v2434_v21 }
 0x2e7   : > { %v1193_v52 = vpop.f32.mrf.mxu0 }
 0x2e8   : > { %1714 = vst [vmem:[%s2439_s22 + $0x30] sm:$0xff] %v1662_v51   ;;  %v1194_v17 = vadd.f32 %v1193_v52, %v2430_v19 }
 0x2e9   : > { %v1834_v44 = vpop.f32.mrf.mxu0 }
 0x2ea   : > { %v1205_v16 = vadd.f32 %v1834_v44, %v2432_v20 }
 0x2eb   : > { %v1196_v15 = vpop.f32.mrf.mxu0 }
 0x2ec   : > { %v1677_v14 = vpack.c.bf16 %v1205_v16, %v1202_v53  ;;  %v1197_v47 = vadd.f32 %v1196_v15, %v2428_v18 }
 0x2ee   : > { %1717 = vst [vmem:[%s2439_s22 + $0x48] sm:$0xff] %v1677_v14   ;;  %v1672_v20 = vpack.c.bf16 %v1197_v47, %v1194_v17 }
 0x2f0   : > { %1716 = vst [vmem:[%s2439_s22 + $0x40] sm:$0xff] %v1672_v20  }
 0x2f1   : > { %1965 = shalt.err (!%p1962_p5)
}
 0x2f2   : > { %s1966_s18 = scalar_lea.hbm %s2473_s10, 2048  ;;  %s1970_s22 = scalar_lea.hbm %s2533_s7, 4096 }
 0x2f3   : > { %p1967_p6 = scmp.ne.s32.totalorder %s2473_s10, %s1966_s18  ;;  %p1971_p10 = scmp.lt.s32.totalorder %s2473_s10, %s2533_s7 }
 0x2f4   : > { %p1972_p11 = scmp.lt.s32.totalorder %s1970_s22, %s1966_s18 }
 0x2f5   : > { %p1968_p7 = pnand %p1967_p6, %p2114_p4 }
 0x2f6   : > { %p1973_p12 = por %p1972_p11, %p1971_p10 }
 0x2f7   : > { %p1969_p9 = pneg %p1968_p7 }
 0x2f9   : > { %p1974_p13 = pnand %p1973_p12, %p1969_p9 }
 0x2fb   : > { %1977 = shalt.err (!%p1974_p13)
}
 0x2fc   : > { %s2032_s8 = smov 64   ;;  %s2033_s12 = smov 4  }
 0x2fd   : > { %1863 = dma.vmem_to_hbm [thread:$0]  (%p2114_p4), %s2475_s23, 2048, %s2473_s10, %s2481_s27, %s2032_s8, %s2032_s8, %s2033_s12  }
 0x2fe PF: > { %p1869_p0 = scmp.ge.s32.totalorder %s2028_s29, 2  ;;  %s1446_s15 = sand.u32 1, %s2008_s24  }
 0x2ff   : > { %s1447_s16 = scalar_lea.sflag [#allocation3], %s1446_s15 }
 0x300   : > { %p1866_p1 = pnand %p1869_p0, %p2121_p8 }
 0x302   : > { %p1867_p2 = pneg %p1866_p1 }
 0x304   : > { %2003 = dma.done.wait (%p1867_p2), %s1447_s16, 2048  }
 0x305   : > { %2005 = vsyncadd (%p1867_p2), %s1447_s16, 4294965248  ;;  %s20_s29 = sadd.s32 1, %s2028_s29   ;;  %s2536_s24 = smov %s2012_s25 }
 0x306   : > { %p17_p3 = scmp.ge.s32.totalorder %s20_s29, 4   ;;  %s2537_s25 = smov %s2016_s26 }
 0x307   : > { %s2538_s26 = smov %s2127_s14  ;;  %s2539_s27 = smov %s2024_s28 }
 0x308   : > { %s2540_s28 = smov %s2542_s9  ;;  %19 = sbr.rel (!%p17_p3) target bundleno = 4 (0x4), region = 83 }
 0x30d   :  { %1452 = vsyncpa [#allocation3], 1 }
 0x30e   :  { %1454 = vsyncpa [#allocation3 + $0x1], 1 }

</bundles_post_ra>
